<compile_context>
chip_gen: v7x
topology: tpu7x:2x2x1
jax: 0.10.0
libtpu: 0.0.40
codegen_flags: <defaults>
</compile_context>

<pallas_src>
import math

import jax
import jax.numpy as jnp
import numpy as np
from jax.experimental import pallas as pl
from jax.experimental.pallas import tpu as pltpu

# Offsets into the concatenated fixed table [month(13), day(32), weekday(7), hour(24)];
# x_mark columns 0,1,2,3 = month, day, weekday, hour (freq='h' -> no minute table).
_FIELD_OFFSETS = (0, 13, 45, 52)
_VOCAB = 13 + 32 + 7 + 24  # 76


def _round_up(n, m):
    return ((n + m - 1) // m) * m


def _data_embedding_kernel(xcat_ref, mark_ref, wconv_ref, table_ref, pe_ref, o_ref):
    # xcat_ref : (1, TL, 3C) f32   [x[t-1] | x[t] | x[t+1]] (circular halo folded in wrapper)
    # mark_ref : (1, TL, 4)  i32   temporal indices with table offsets pre-added
    # wconv_ref: (3C, Dp)    f32   flattened Conv1d weight (tap k -> channel block k)
    # table_ref: (V, Dp)     bf16  concatenated fixed sinusoidal tables
    # pe_ref   : (TL, Dp)    bf16  positional-embedding tile
    # o_ref    : (1, TL, Dp) f32
    xcat = xcat_ref[0]                                     # (TL, 3C)

    # --- circular Conv1d(k=3, pad=1, no bias): ONE fused MXU matmul ---
    val = jnp.dot(xcat, wconv_ref[...], preferred_element_type=jnp.float32)

    # --- temporal embedding: 4 table lookups as a single multi-hot matmul ---
    idx = mark_ref[0]                                      # (TL, 4), offsets pre-added
    tl = idx.shape[0]
    v = table_ref.shape[0]
    lane = jax.lax.broadcasted_iota(jnp.int32, (tl, v), 1)
    hit = lane == idx[:, 0:1]
    for f in range(1, idx.shape[1]):                       # disjoint vocab ranges -> OR == sum
        hit = hit | (lane == idx[:, f:f + 1])
    multihot = hit.astype(jnp.float32)
    temporal = jnp.dot(multihot, table_ref[...].astype(jnp.float32),
                       preferred_element_type=jnp.float32)

    # --- add positional embedding; dropout = identity in eval mode ---
    o_ref[0] = (val + temporal + pe_ref[...].astype(jnp.float32)).astype(o_ref.dtype)


def data_embedding(x, x_mark, w_conv, table_bf16, pe_bf16, *, tile_l=512):
    """DataEmbedding forward.

    x:          (B, L, C)   float
    x_mark:     (B, L, 4)   int   columns = (month, day, weekday, hour)
    w_conv:     (D, C, 3)   float torch Conv1d weight layout (O, C, K)
    table_bf16: (76, D)     fixed sinusoidal tables (stored bf16)
    pe_bf16:    (>=L, D)    positional table (stored bf16)
    returns:    (B, L, D)   float32
    """
    B, L, C = x.shape
    D = w_conv.shape[0]
    V = table_bf16.shape[0]
    n_mark = 4

    Dp = _round_up(D, 128)  # lane-dense output / pe / table / weight last dim

    # Fold the circular halo into the channel axis so L-tiles are independent.
    x = x.astype(jnp.float32)
    x_cat = jnp.concatenate(
        [jnp.roll(x, 1, axis=1), x, jnp.roll(x, -1, axis=1)], axis=-1)   # (B, L, 3C)

    # Pre-add vocab offsets so the kernel compares against a single iota.
    marks = x_mark[..., :n_mark].astype(jnp.int32) + jnp.asarray(_FIELD_OFFSETS, jnp.int32)

    # Flatten Conv1d weight (D, C, 3) -> (3C, Dp); tap k pairs with channel block k of x_cat.
    w_flat = jnp.transpose(w_conv.astype(jnp.float32), (2, 1, 0)).reshape(3 * C, D)
    w_flat = jnp.pad(w_flat, ((0, 0), (0, Dp - D)))

    table_p = jnp.pad(table_bf16.astype(jnp.bfloat16), ((0, 0), (0, Dp - D)))
    pe_p = jnp.pad(pe_bf16[:L].astype(jnp.bfloat16), ((0, 0), (0, Dp - D)))

    # L tiling: bounded VMEM + enough grid steps to hide DMA; 16-row quantum (bf16 packing).
    TL = _round_up(L, 16) if L <= tile_l else tile_l
    Lp = _round_up(L, TL)
    if Lp != L:
        pad = Lp - L
        x_cat = jnp.pad(x_cat, ((0, 0), (0, pad), (0, 0)))
        marks = jnp.pad(marks, ((0, 0), (0, pad), (0, 0)))
        pe_p = jnp.pad(pe_p, ((0, pad), (0, 0)))

    out = pl.pallas_call(
        _data_embedding_kernel,
        out_shape=jax.ShapeDtypeStruct((B, Lp, Dp), jnp.float32),
        grid_spec=pltpu.PrefetchScalarGridSpec(
            num_scalar_prefetch=0,
            grid=(B, Lp // TL),
            in_specs=[
                pl.BlockSpec((1, TL, 3 * C), lambda b, l: (b, l, 0)),
                pl.BlockSpec((1, TL, n_mark), lambda b, l: (b, l, 0)),
                pl.BlockSpec((3 * C, Dp), lambda b, l: (0, 0)),   # grid-invariant
                pl.BlockSpec((V, Dp), lambda b, l: (0, 0)),       # grid-invariant
                pl.BlockSpec((TL, Dp), lambda b, l: (l, 0)),
            ],
            out_specs=pl.BlockSpec((1, TL, Dp), lambda b, l: (b, l, 0)),
        ),
        compiler_params=pltpu.CompilerParams(
            dimension_semantics=("parallel", "parallel"),
            vmem_limit_bytes=32 * 1024 * 1024,
        ),
    )(x_cat, marks, w_flat, table_p, pe_p)
    return out[:, :L, :D]


# ---------------- parameter / buffer construction (plain JAX glue) ----------------

def _sinusoid_table(n, d):
    """Same formula as PositionalEmbedding / FixedEmbedding in the PyTorch code."""
    pe = np.zeros((n, d), np.float32)
    pos = np.arange(n, dtype=np.float32)[:, None]
    div = np.exp(np.arange(0, d, 2, dtype=np.float32) * -(math.log(10000.0) / d))
    pe[:, 0::2] = np.sin(pos * div)
    pe[:, 1::2] = np.cos(pos * div)
    return pe


def make_params(c_in, d_model, key, max_len=5000):
    # Conv1d weight, kaiming_normal_(mode='fan_in', nonlinearity='leaky_relu')
    gain = math.sqrt(2.0 / (1.0 + 0.01 ** 2))
    fan_in = c_in * 3
    std = gain / math.sqrt(fan_in)
    w_conv = std * jax.random.normal(key, (d_model, c_in, 3), jnp.float32)  # torch (O, C, K)

    table = jnp.asarray(np.concatenate([
        _sinusoid_table(13, d_model),   # month
        _sinusoid_table(32, d_model),   # day
        _sinusoid_table(7, d_model),    # weekday
        _sinusoid_table(24, d_model),   # hour
    ], axis=0))                                                             # (76, D)

    # bf16 storage for the big read-only streams; arithmetic stays f32 in-kernel.
    table_bf16 = table.astype(jnp.bfloat16)
    pe_bf16 = jnp.asarray(_sinusoid_table(max_len, d_model)).astype(jnp.bfloat16)
    return w_conv, table_bf16, pe_bf16


def reference(x, x_mark, w_conv, table_f32, pe_f32):
    """Pure-JAX reference matching the PyTorch forward (eval mode)."""
    B, L, C = x.shape
    xp = jnp.concatenate([x[:, -1:, :], x, x[:, :1, :]], axis=1)   # circular pad
    val = 0.0
    for k in range(3):
        val = val + jnp.einsum('blc,oc->blo', xp[:, k:k + L, :], w_conv[:, :, k])
    temporal = 0.0
    for f, off in enumerate(_FIELD_OFFSETS):
        temporal = temporal + table_f32[x_mark[:, :, f] + off]
    return val + temporal + pe_f32[None, :L]


if __name__ == "__main__":
    B, L, c_in, d_model = 2, 8, 4, 32
    key = jax.random.PRNGKey(0)
    k_w, k_x, k_mo, k_da, k_wd, k_hr = jax.random.split(key, 6)

    w_conv, table_bf16, pe_bf16 = make_params(c_in, d_model, k_w)

    x = jax.random.normal(k_x, (B, L, c_in), jnp.float32)
    x_mark = jnp.stack([
        jax.random.randint(k_mo, (B, L), 0, 13),   # month
        jax.random.randint(k_da, (B, L), 0, 32),   # day
        jax.random.randint(k_wd, (B, L), 0, 7),    # weekday
        jax.random.randint(k_hr, (B, L), 0, 24),   # hour
    ], axis=-1).astype(jnp.int32)                   # (B, L, 4)

    out = data_embedding(x, x_mark, w_conv, table_bf16, pe_bf16)
    out = jax.block_until_ready(out)

    ref = reference(x, x_mark, w_conv,
                    table_bf16.astype(jnp.float32), pe_bf16.astype(jnp.float32))
    np.testing.assert_allclose(np.asarray(out), np.asarray(ref), rtol=1e-5, atol=1e-5)

    print("KERNEL_OK")
</pallas_src>

<mosaic_0001>
module attributes {stable_mosaic.version = 11 : i64} {
  func.func @_data_embedding_kernel(%arg0: i32, %arg1: i32, %arg2: memref<1x16x12xf32, #tpu.memory_space<vmem>>, %arg3: memref<1x16x4xi32, #tpu.memory_space<vmem>>, %arg4: memref<12x128xf32, #tpu.memory_space<vmem>>, %arg5: memref<76x128xbf16, #tpu.memory_space<vmem>>, %arg6: memref<16x128xbf16, #tpu.memory_space<vmem>>, %arg7: memref<1x16x128xf32, #tpu.memory_space<vmem>>) attributes {dimension_semantics = [#tpu.dimension_semantics<parallel>, #tpu.dimension_semantics<parallel>], iteration_bounds = array<i64: 2, 1>, scalar_prefetch = 0 : i64, scratch_operands = 0 : i64, tpu.core_type = #tpu.core_type<tc>, window_params = [{transform_indices = @transform_0, window_bounds = array<i64: 1, 16, 12>}, {transform_indices = @transform_1, window_bounds = array<i64: 1, 16, 4>}, {pipeline_mode = #tpu.pipeline_mode<synchronous>, transform_indices = @transform_2, window_bounds = array<i64: 12, 128>}, {pipeline_mode = #tpu.pipeline_mode<synchronous>, transform_indices = @transform_3, window_bounds = array<i64: 76, 128>}, {transform_indices = @transform_4, window_bounds = array<i64: 16, 128>}, {transform_indices = @transform_5, window_bounds = array<i64: 1, 16, 128>}]} {
    %c0 = arith.constant 0 : index
    %c0_0 = arith.constant 0 : index
    %c0_1 = arith.constant 0 : index
    %0 = vector.load %arg2[%c0, %c0_0, %c0_1] : memref<1x16x12xf32, #tpu.memory_space<vmem>>, vector<1x16x12xf32>
    %1 = vector.shape_cast %0 : vector<1x16x12xf32> to vector<16x12xf32>
    %c0_2 = arith.constant 0 : index
    %c0_3 = arith.constant 0 : index
    %2 = vector.load %arg4[%c0_2, %c0_3] : memref<12x128xf32, #tpu.memory_space<vmem>>, vector<12x128xf32>
    %cst = arith.constant dense<0.000000e+00> : vector<16x128xf32>
    %3 = tpu.matmul %1, %2, %cst {dimension_numbers = #tpu.dot_dimension_numbers<[1], [0], [0], [1], [0, 0, 1, 1], [], []>} : vector<16x12xf32>, vector<12x128xf32>, vector<16x128xf32> -> vector<16x128xf32>
    %c0_4 = arith.constant 0 : index
    %c0_5 = arith.constant 0 : index
    %c0_6 = arith.constant 0 : index
    %4 = vector.load %arg3[%c0_4, %c0_5, %c0_6] : memref<1x16x4xi32, #tpu.memory_space<vmem>>, vector<1x16x4xi32>
    %5 = vector.shape_cast %4 : vector<1x16x4xi32> to vector<16x4xi32>
    %6 = tpu.iota {dimensions = array<i32: 1>} : vector<16x76xi32>
    %7 = vector.extract_strided_slice %5 {offsets = [0, 0], sizes = [16, 1], strides = [1, 1]} : vector<16x4xi32> to vector<16x1xi32>
    %8 = vector.broadcast %7 : vector<16x1xi32> to vector<16x76xi32>
    %9 = arith.cmpi eq, %6, %8 : vector<16x76xi32>
    %10 = vector.extract_strided_slice %5 {offsets = [0, 1], sizes = [16, 1], strides = [1, 1]} : vector<16x4xi32> to vector<16x1xi32>
    %11 = vector.broadcast %10 : vector<16x1xi32> to vector<16x76xi32>
    %12 = arith.cmpi eq, %6, %11 : vector<16x76xi32>
    %13 = arith.ori %9, %12 : vector<16x76xi1>
    %14 = vector.extract_strided_slice %5 {offsets = [0, 2], sizes = [16, 1], strides = [1, 1]} : vector<16x4xi32> to vector<16x1xi32>
    %15 = vector.broadcast %14 : vector<16x1xi32> to vector<16x76xi32>
    %16 = arith.cmpi eq, %6, %15 : vector<16x76xi32>
    %17 = arith.ori %13, %16 : vector<16x76xi1>
    %18 = vector.extract_strided_slice %5 {offsets = [0, 3], sizes = [16, 1], strides = [1, 1]} : vector<16x4xi32> to vector<16x1xi32>
    %19 = vector.broadcast %18 : vector<16x1xi32> to vector<16x76xi32>
    %20 = arith.cmpi eq, %6, %19 : vector<16x76xi32>
    %21 = arith.ori %17, %20 : vector<16x76xi1>
    %22 = arith.extui %21 : vector<16x76xi1> to vector<16x76xi32>
    %23 = arith.sitofp %22 : vector<16x76xi32> to vector<16x76xf32>
    %c0_7 = arith.constant 0 : index
    %c0_8 = arith.constant 0 : index
    %24 = vector.load %arg5[%c0_7, %c0_8] : memref<76x128xbf16, #tpu.memory_space<vmem>>, vector<76x128xbf16>
    %25 = arith.extf %24 : vector<76x128xbf16> to vector<76x128xf32>
    %cst_9 = arith.constant dense<0.000000e+00> : vector<16x128xf32>
    %26 = tpu.matmul %23, %25, %cst_9 {dimension_numbers = #tpu.dot_dimension_numbers<[1], [0], [0], [1], [0, 0, 1, 1], [], []>} : vector<16x76xf32>, vector<76x128xf32>, vector<16x128xf32> -> vector<16x128xf32>
    %27 = arith.addf %3, %26 : vector<16x128xf32>
    %c0_10 = arith.constant 0 : index
    %c0_11 = arith.constant 0 : index
    %28 = vector.load %arg6[%c0_10, %c0_11] : memref<16x128xbf16, #tpu.memory_space<vmem>>, vector<16x128xbf16>
    %29 = arith.extf %28 : vector<16x128xbf16> to vector<16x128xf32>
    %30 = arith.addf %27, %29 : vector<16x128xf32>
    %c0_12 = arith.constant 0 : index
    %c0_13 = arith.constant 0 : index
    %c0_14 = arith.constant 0 : index
    %31 = vector.load %arg7[%c0_12, %c0_13, %c0_14] : memref<1x16x128xf32, #tpu.memory_space<vmem>>, vector<1x16x128xf32>
    %32 = vector.shape_cast %31 : vector<1x16x128xf32> to vector<16x128xf32>
    %33 = vector.shape_cast %30 : vector<16x128xf32> to vector<1x16x128xf32>
    tpu.vector_store %arg7[%c0_12, %c0_13, %c0_14], %33 {strides = array<i32>} : memref<1x16x128xf32, #tpu.memory_space<vmem>>, vector<1x16x128xf32>,
    return
  }
  func.func @transform_0(%arg0: i32, %arg1: i32) -> (i32, i32, i32) {
    %c0_i32 = arith.constant 0 : i32
    %c0_i32_0 = arith.constant 0 : i32
    return %arg0, %arg1, %c0_i32 : i32, i32, i32
  }
  func.func @transform_1(%arg0: i32, %arg1: i32) -> (i32, i32, i32) {
    %c0_i32 = arith.constant 0 : i32
    %c0_i32_0 = arith.constant 0 : i32
    return %arg0, %arg1, %c0_i32 : i32, i32, i32
  }
  func.func @transform_2(%arg0: i32, %arg1: i32) -> (i32, i32) {
    %c0_i32 = arith.constant 0 : i32
    %c0_i32_0 = arith.constant 0 : i32
    %c0_i32_1 = arith.constant 0 : i32
    return %c0_i32, %c0_i32_0 : i32, i32
  }
  func.func @transform_3(%arg0: i32, %arg1: i32) -> (i32, i32) {
    %c0_i32 = arith.constant 0 : i32
    %c0_i32_0 = arith.constant 0 : i32
    %c0_i32_1 = arith.constant 0 : i32
    return %c0_i32, %c0_i32_0 : i32, i32
  }
  func.func @transform_4(%arg0: i32, %arg1: i32) -> (i32, i32) {
    %c0_i32 = arith.constant 0 : i32
    %c0_i32_0 = arith.constant 0 : i32
    return %arg1, %c0_i32 : i32, i32
  }
  func.func @transform_5(%arg0: i32, %arg1: i32) -> (i32, i32, i32) {
    %c0_i32 = arith.constant 0 : i32
    %c0_i32_0 = arith.constant 0 : i32
    return %arg0, %arg1, %c0_i32 : i32, i32, i32
  }
}

</mosaic_0001>

<bundles_post_ra>
// kernel: tpu_custom_call.1
= control target key start
LH: loop header
LB: loop body
LE: loop exit
PB: predicated region body
PF: predicated region fallthrough
CT: control target
= control target key end

     0   :  { %10 = vsyncpa [#allocation3], 0  ;;  %s1157_s0 = inlined_call_operand.vmem [shape: f32[2,16,12], index: 0, kind: input, shape index: {}]   ;;  %s1158_s1 = inlined_call_operand.vmem [shape: s32[2,16,4], index: 1, kind: input, shape index: {}]   ;;  %s1159_s2 = inlined_call_operand.vmem [shape: f32[12,128], index: 2, kind: input, shape index: {}]   ;;  %s1160_s3 = inlined_call_operand.vmem [shape: bf16[76,128], index: 3, kind: input, shape index: {}]   ;;  %s1161_s4 = inlined_call_operand.vmem [shape: bf16[16,128], index: 4, kind: input, shape index: {}]   ;;  %s1162_s5 = inlined_call_operand.hbm [shape: f32[2,16,128], index: 5, kind: output, shape index: {}]  }
   0x1   :  { %12 = vsyncpa [#allocation3 + $0x1], 0  ;;  %s1008_s18 = smov 0   ;;  %s1010_s19 = smov 0  }
   0x2   :  { %s1012_s20 = smov 0   ;;  %s1014_s21 = smov 0  }
   0x3   :  { %s1016_s22 = smov 0   ;;  %s1018_s23 = smov 0  }
   0x4 LB: > { %s689_s24 = sadd.s32 4294967295, %s967_s23   ;;  %s690_s25 = sadd.s32 4294967294, %s967_s23   ;;  %s967_s23 = sphi %s1018_s23, %s18_s23   ;;  %s963_s22 = sphi %s1016_s22, %s1169_s22   ;;  %s959_s21 = sphi %s1014_s21, %s1168_s21   ;;  %s955_s20 = sphi %s1012_s20, %s1167_s20   ;;  %s951_s19 = sphi %s1010_s19, %s1166_s19   ;;  %s947_s18 = sphi %s1008_s18, %s1165_s18  }
   0x5   : > { %s30_s26 = sadd.s32 1, %s963_s22  ;;  %s163_s27 = sadd.s32 1, %s955_s20 }
   0x6   : > { %p32_p0 = scmp.ge.s32.totalorder %s30_s26, 2  ;;  %p173_p1 = scmp.ne.s32.totalorder %s955_s20, %s951_s19 }
   0x7   : > { %p174_p2 = scmp.eq.s32.totalorder %s689_s24, 1  ;;  %p179_p3 = scmp.ne.s32.totalorder %s951_s19, %s947_s18 }
   0x8   : > { %s1171_s26 = smov (%p32_p0, %s30_s26), 0  ;;  %p180_p5 = scmp.eq.s32.totalorder %s690_s25, 1 }
   0x9   : > { %p1048_p4 = por %p174_p2, %p173_p1  ;;  %s158_s29 = ssub.s32 %s963_s22, %s1171_s26 }
   0xa   : > { %p694_p6 = scmp.ge.s32.totalorder %s967_s23, 1  ;;  %p161_p7 = scmp.eq.s32.totalorder %s158_s29, 0 }
   0xb   : > { %p1055_p8 = por %p180_p5, %p179_p3  ;;  %p239_p9 = scmp.lt.s32.totalorder %s967_s23, 3 }
   0xc   : > { %s1061_s6 = scalar_select %p161_p7, %s955_s20, %s163_s27  }
   0xd   : > { %p240_p10 = pnand %p694_p6, %p239_p9 }
   0xe   : > { %p286_p11 = scmp.lt.s32.totalorder (!%p240_p10), %s959_s21, 1  ;;  %v969_v0 = vmov (!%p240_p10), 0   ;;  %v717_v3 = vld [vmem:[%s1160_s3] sm:$0xff] (!%p240_p10)   ;;  %v970_v4 = vmov (!%p240_p10), 1   ;;  %v736_v5 = vld [vmem:[%s1160_s3 + $0x8] sm:$0xff] (!%p240_p10)   ;;  %v971_v6 = vmov (!%p240_p10), 2   ;;  %v318_v18 = vlaneseq (!%p240_p10) }
   0xf   : > { %243 = sbr.rel (%p240_p10) target bundleno = 409 (0x199), region = 40  ;;  %882 = vset.pattern.permute.xlu1 (!%p240_p10), %v969_v0  ;;  %880 = vset.pattern.permute.xlu0 (!%p240_p10), %v969_v0  ;;  %v737_v7 = vld [vmem:[%s1160_s3 + $0x10] sm:$0xff] (!%p240_p10)   ;;  %v738_v8 = vld [vmem:[%s1160_s3 + $0x18] sm:$0xff] (!%p240_p10)   ;;  %v972_v9 = vmov (!%p240_p10), 3   ;;  %v314_v10 = vld [vmem:[%s1159_s2] sm:$0xff] (!%p240_p10)  ;;  %vm389_vm0 = vcmask (!%p240_p10), 1043456  }
  0x10   : > { %786 = vmatprep.subr.bf16.mxu1 (!%p240_p10), %v717_v3  ;;  %v315_v11 = vld [vmem:[%s1159_s2 + $0x8] sm:$0xf] (!%p240_p10)  ;;  %vm973_vm1 = vmmov (!%p240_p10), 1   ;;  %v888_v13 = vld [vmem:[%s1160_s3 + $0x20] sm:$0x3f] (!%p240_p10)   ;;  %vm468_vm3 = vcmask (!%p240_p10), 97280  }
  0x11   : > { %788 = vmatpush3.bf16.msra.mxu1 (!%p240_p10), %v717_v3  ;;  %vm802_vm2 = vmpackc.low (!%p240_p10), %vm389_vm0, %vm973_vm1  ;;  %v807_v12 = vpack.c.bf16 (!%p240_p10), %v315_v11, %v314_v10  ;;  %v319_v20 = vand.u32 (!%p240_p10), 127, %v318_v18  ;;  %vm382_vm11 = vcmask (!%p240_p10), 621568   ;;  %v974_v25 = vmov (!%p240_p10), 0.0   ;;  %v733_v31 = vld [vmem:[%s1161_s4] sm:$0xff] (!%p240_p10)   ;;  %s715_s27 = sshll.u32 (!%p240_p10), %s959_s21, 8  ;;  %s975_s12 = smov (!%p240_p10), [#allocation2]  }
  0x12   : > { %790 = vmatprep.subr.bf16.mxu1 (!%p240_p10), %v736_v5  ;;  %v735_v32 = vunpack.c.h.bf16 (!%p240_p10), %v733_v31  ;;  %v734_v34 = vunpack.c.l.bf16 (!%p240_p10), %v733_v31  ;;  %s1109_s10 = scalar_lea.hbm (!%p240_p10), %s1162_s5, %s715_s27  ;;  %s893_s13 = sshll.u32 (!%p240_p10), %s975_s12, 4  ;;  %s894_s13 = int_to_ptr.vmem [resolvable:$false] %s893_s13 }
  0x13   : > { %809 = vmatprep.subr.msk.bf16.mxu0 (!%p240_p10), %vm802_vm2, %v807_v12  ;;  %s895_s14 = scalar_lea.vmem (!%p240_p10), %s894_s13, 512 }
  0x14   : > { %812 = vmatpush3.bf16.msk.msra.mxu0 (!%p240_p10), %vm802_vm2, %v807_v12 }
  0x15   : > { %792 = vmatpush3.bf16.msra.mxu1 (!%p240_p10), %v736_v5 }
  0x16   : > { %s1065_s7 = scalar_select %p286_p11, %s959_s21, 1  ;;  %794 = vmatprep.subr.bf16.mxu1 %v737_v7 }
  0x18   : > { %s713_s8 = sshll.u32 %s1065_s7, 4  ;;  %s282_s7 = sand.u32 1, %s951_s19  }
  0x19   : > { %s303_s11 = scalar_lea.vmem %s1158_s1, %s713_s8  ;;  %796 = vmatpush3.bf16.msra.mxu1 %v737_v7  ;;  %s293_s15 = scalar_lea.vmem %s1157_s0, %s713_s8 }
  0x1a   : > { %v317_v1 = vld [vmem:[%s303_s11 + $0x8] sm:$0xff]  ;;  %v316_v2 = vld [vmem:[%s303_s11] sm:$0xff]  ;;  %798 = vmatprep.subr.bf16.mxu1 %v738_v8  ;;  %s695_s8 = sshll.u32 %s282_s7, 4  ;;  %s1111_s11 = scalar_lea.sflag [#allocation3], %s282_s7 }
  0x1b   : > { %324 = vperm.xlu1 %882, %v317_v1   ;;  %321 = vperm.xlu0 %880, %v316_v2   ;;  %v312_v14 = vld [vmem:[%s293_s15] sm:$0xff]  ;;  %v313_v15 = vld [vmem:[%s293_s15 + $0x8] sm:$0xff]  ;;  %s284_s24 = scalar_lea.vmem [#allocation2], %s695_s8 }
  0x1c   : > { %782 = vmatprep.mubr.msk.f32.mxu0 %vm468_vm3, %v312_v14  ;;  %s577_s25 = sshll.u32 %s284_s24, 4  ;;  %s1104_s25 = int_to_ptr.vmem [resolvable:$true] %s577_s25 }
  0x1d   : > { %800 = vmatpush3.bf16.msra.mxu1 %v738_v8  ;;  %783 = vmatmul.mubr.msk.f32.vlgmr.msra.gmra.mrb[0].mxu0 %vm468_vm3, %v313_v15  ;;  %s889_s21 = scalar_lea.vmem %s1104_s25, 256  ;;  %p896_p1 = scmp.lt.s32.totalorder %s1104_s25, %s894_s13 }
  0x1e   : > { %803 = vmatprep.subr.msk.bf16.mxu1 %vm802_vm2, %v888_v13  ;;  %p890_p12 = scmp.ne.s32.totalorder %s1104_s25, %s889_s21  ;;  %p897_p2 = scmp.lt.s32.totalorder %s895_s14, %s889_s21 }
  0x1f   : > { %883 = vset.pattern.permute.xlu1 %v970_v4  ;;  %881 = vset.pattern.permute.xlu0 %v970_v4 }
  0x20   : > { %332 = vperm.xlu1 %883, %v317_v1   ;;  %329 = vperm.xlu0 %881, %v316_v2   ;;  %p891_p13 = pnand %p890_p12, %p1048_p4  ;;  %p898_p3 = por %p897_p2, %p896_p1 }
  0x21   : > { %806 = vmatpush3.bf16.msk.msra.mxu1 %vm802_vm2, %v888_v13 }
  0x22   : > { %p892_p0 = pneg %p891_p13 }
  0x24   : > { %884 = vset.pattern.permute.xlu1 %v971_v6  ;;  %885 = vset.pattern.permute.xlu0 %v971_v6  ;;  %p899_p5 = pnand %p898_p3, %p892_p0 }
  0x25   : > { %339 = vperm.xlu1 %884, %v316_v2   ;;  %342 = vperm.xlu0 %885, %v317_v1  }
  0x29   : > { %886 = vset.pattern.permute.xlu1 %v972_v9  ;;  %887 = vset.pattern.permute.xlu0 %v972_v9 }
  0x2a   : > { %349 = vperm.xlu1 %886, %v316_v2  }
  0x2e   : > { %352 = vperm.xlu1 %886, %v317_v1  }
  0x9a   : > { %v325_v16 = vpop.permute.xlu1 %324  ;;  %v322_v17 = vpop.permute.xlu0 %321 }
  0x9b   : > { %vm326_vm4 = vcmp.eq.s32.totalorder %v319_v20, %v322_v17  ;;  %vm327_vm14 = vcmp.eq.s32.totalorder %v319_v20, %v325_v16 }
  0x9f   : > { %v333_v19 = vpop.permute.xlu1 %332  ;;  %v330_v21 = vpop.permute.xlu0 %329 }
  0xa0   : > { %vm334_vm5 = vcmp.eq.s32.totalorder %v319_v20, %v330_v21  ;;  %vm335_vm8 = vcmp.eq.s32.totalorder %v319_v20, %v333_v19 }
  0xa1   : > { %vm336_vm6 = vmor %vm326_vm4, %vm334_vm5 }
  0xa2   : > { %vm337_vm15 = vmor %vm327_vm14, %vm335_vm8 }
  0xa4   : > { %v340_v22 = vpop.permute.xlu1 %339  ;;  %v343_v23 = vpop.permute.xlu0 %342 }
  0xa5   : > { %vm344_vm7 = vcmp.eq.s32.totalorder %v319_v20, %v340_v22  ;;  %vm345_vm12 = vcmp.eq.s32.totalorder %v319_v20, %v343_v23 }
  0xa6   : > { %vm346_vm9 = vmor %vm336_vm6, %vm344_vm7 }
  0xa7   : > { %vm347_vm0 = vmor %vm337_vm15, %vm345_vm12 }
  0xa9   : > { %v350_v24 = vpop.permute.xlu1 %349 }
  0xaa   : > { %vm354_vm10 = vcmp.eq.s32.totalorder %v319_v20, %v350_v24 }
  0xab   : > { %vm356_vm13 = vmor %vm346_vm9, %vm354_vm10 }
  0xac   : > { %v700_v26 = vsel %vm356_vm13, 1.0, %v974_v25 }
  0xad   : > { %v353_v27 = vpop.permute.xlu1 %352  ;;  %775 = vmatprep.mubr.msk.f32.mxu1 %vm382_vm11, %v700_v26 }
  0xae   : > { %vm355_vm1 = vcmp.eq.s32.totalorder %v319_v20, %v353_v27 }
  0xaf   : > { %vm357_vm2 = vmor %vm347_vm0, %vm355_vm1 }
  0xb0   : > { %v701_v28 = vsel %vm357_vm2, 1.0, %v974_v25 }
  0xb1   : > { %776 = vmatmul.mubr.msk.f32.vlgmr.msra.gmra.mrb[0].mxu1 %vm382_vm11, %v701_v28 }
  0xf0   : > { %v784_v29 = vpop.f32.mrb[0].mxu0 }
  0xf1   : > { %v544_v30 = vpop.f32.mrb[1].mxu0 }
 0x184   : > { %v777_v33 = vpop.f32.mrb[0].mxu1 }
 0x185   : > { %v550_v35 = vadd.f32 %v784_v29, %v777_v33  ;;  %v459_v36 = vpop.f32.mrb[1].mxu1 }
 0x186   : > { %v545_v37 = vadd.f32 %v544_v30, %v459_v36 }
 0x187   : > { %v558_v38 = vadd.f32 %v735_v32, %v550_v35 }
 0x188   : > { %v557_v39 = vadd.f32 %v734_v34, %v545_v37 }
 0x189   : > { %560 = vst [vmem:[%s284_s24 + $0x8] sm:$0xff] %v558_v38 }
 0x18a   : > { %559 = vst [vmem:[%s284_s24] sm:$0xff] %v557_v39 }
 0x18b   : > { %902 = shalt.err (!%p899_p5)
}
 0x18c   : > { %s903_s15 = scalar_lea.hbm %s1109_s10, 256  ;;  %s907_s16 = scalar_lea.hbm %s1162_s5, 512 }
 0x18d   : > { %p904_p6 = scmp.ne.s32.totalorder %s1109_s10, %s903_s15  ;;  %p908_p10 = scmp.lt.u32.totalorder %s1109_s10, %s1162_s5 }
 0x18e   : > { %p909_p11 = scmp.lt.u32.totalorder %s907_s16, %s903_s15  ;;  %p911_p13 = scmp.lt.u32.totalorder %s903_s15, %s1109_s10 }
 0x18f   : > { %p905_p7 = pnand %p904_p6, %p1048_p4 }
 0x190   : > { %p910_p12 = por %p909_p11, %p908_p10 }
 0x191   : > { %p906_p9 = pneg %p905_p7 }
 0x192   : > { %p912_p0 = por %p911_p13, %p910_p12 }
 0x194   : > { %p913_p1 = pnand %p912_p0, %p906_p9 }
 0x196   : > { %916 = shalt.err (!%p913_p1)
}
 0x197   : > { %s976_s27 = smov 128   ;;  %s977_s29 = smov 8  }
 0x198   : > { %817 = dma.vmem_to_hbm [thread:$0]  (%p1048_p4), %s1104_s25, 256, %s1109_s10, %s1111_s11, %s976_s27, %s976_s27, %s977_s29  }
 0x199 PF: > { %p823_p2 = scmp.ge.s32.totalorder %s967_s23, 2  ;;  %s592_s9 = sand.u32 1, %s947_s18  }
 0x19a   : > { %s593_s21 = scalar_lea.sflag [#allocation3], %s592_s9 }
 0x19b   : > { %p820_p3 = pnand %p823_p2, %p1055_p8 }
 0x19d   : > { %942 = dma.done.wait (!%p820_p3), %s593_s21, 256  }
 0x19e   : > { %944 = vsyncadd (!%p820_p3), %s593_s21, 4294967040  ;;  %s18_s23 = sadd.s32 1, %s967_s23   ;;  %s1165_s18 = smov %s951_s19 }
 0x19f   : > { %p15_p5 = scmp.ge.s32.totalorder %s18_s23, 4   ;;  %s1166_s19 = smov %s955_s20 }
 0x1a0   : > { %s1167_s20 = smov %s1061_s6  ;;  %s1168_s21 = smov %s963_s22 }
 0x1a1   : > { %s1169_s22 = smov %s1171_s26  ;;  %17 = sbr.rel (!%p15_p5) target bundleno = 4 (0x4), region = 81 }
 0x1a8   :  { %598 = vsyncpa [#allocation3], 1 }
 0x1a9   :  { %600 = vsyncpa [#allocation3 + $0x1], 1 }

</bundles_post_ra>
